<compile_context>
chip_gen: v7x
topology: tpu7x:2x2x1
jax: 0.10.0
libtpu: 0.0.40
codegen_flags: <defaults>
</compile_context>

<pallas_src>
import functools

import jax
import jax.numpy as jnp
import numpy as np
from jax import lax
from jax.experimental import pallas as pl
from jax.experimental.pallas import tpu as pltpu


def _mhga_kernel(alpha, x_ref, gs_ref, w_ref, bt_ref, b_ref, o_ref):
    """One grid step processes TB graphs.

    x_ref : [TB, N, C]  node features (padded; invalid rows masked via gs_ref)
    gs_ref: [TB, 1]     number of valid nodes per graph (int32)
    w_ref : [C, 2L]     fused weight: cols 0:HC = W, cols L:L+HC = head-expanded W@T
    bt_ref: [1, L]      head-expanded bias@T (score bias), zero past HC
    b_ref : [1, L]      projection bias, zero past HC (added once in the epilogue)
    o_ref : [TB, L]     lane-dense output (cols >= HC are exactly 0)
    """
    # alpha is a plain Python float baked in via functools.partial.
    tb, n, c = x_ref.shape
    l = w_ref.shape[1] // 2

    x = x_ref[...].reshape(tb * n, c)                                     # [TB*N, C]

    # Single MXU stream: projection + head-expanded scores share one matmul.
    xw = jnp.dot(x, w_ref[...], preferred_element_type=jnp.float32)      # [TB*N, 2L]
    vg = xw[:, :l].reshape(tb, n, l)           # projected feats; cols >= HC are 0
    scores = (xw[:, l:] + bt_ref[...]).reshape(tb, n, l)   # per-head scores, already
                                                           # broadcast over C columns

    # Leaky ReLU (all C columns of a head carry the same score value, so the
    # elementwise op preserves the per-head structure).
    scores = jnp.where(scores > 0, scores, alpha * scores)

    # Masked per-graph softmax over the node axis (per column == per head).
    gs = gs_ref[...]                                                      # [TB, 1]
    node = lax.broadcasted_iota(jnp.int32, (tb, n, l), 1)
    valid = node < gs[:, :, None]
    scores = jnp.where(valid, scores, jnp.finfo(jnp.float32).min)
    m = jnp.max(scores, axis=1, keepdims=True)                            # [TB, 1, L]
    p = jnp.where(valid, jnp.exp(scores - m), 0.0)                        # [TB, N, L]
    denom = jnp.sum(p, axis=1, keepdims=True)                             # [TB, 1, L]
    denom = jnp.where(denom > 0, denom, 1.0)      # guard empty graphs (no NaN)
    attn = p * (1.0 / denom)       # exact divide on the tiny denominator (negligible)

    # Weighted node sum. vg columns >= HC are exactly 0, so the padded attention
    # columns contribute nothing. Bias added once (softmax weights sum to 1).
    weighted = attn * vg                                                  # [TB, N, L]
    nonempty = (gs > 0).astype(jnp.float32)                               # [TB, 1]
    out = jnp.sum(weighted, axis=1) + nonempty * b_ref[...]               # [TB, L]
    o_ref[...] = out.astype(o_ref.dtype)


def multi_head_global_attention(V, graph_size, weight, tune_weight, bias, *,
                                n_head, n_feats, alpha=0.2, graphs_per_block=128):
    """V: [B, N, C] f32, graph_size: [B] int32. Returns [B, n_head * n_feats]."""
    B, N, C = V.shape
    H = n_head
    HC = H * C
    assert C == n_feats and weight.shape == (C, HC)

    # Lane-dense padded feature width (multiple of 128).
    L = 128 * pl.cdiv(HC, 128)

    # --- batch tile size (sweep 64-512 for large B; re-derive per TPU gen) ---
    TB = max(8, (int(graphs_per_block) // 8) * 8)
    TB = min(TB, 8 * pl.cdiv(B, 8))          # don't pad tiny batches to a huge tile
    if B > 8 and TB >= 8 * pl.cdiv(B, 8):
        # Prefer >= 2 grid steps so the "parallel" batch axis can shard across
        # v7x's two TensorCores (no effect on single-TC v5e / v6e).
        TB = max(8, 8 * pl.cdiv(pl.cdiv(B, 2), 8))
    B_pad = TB * pl.cdiv(B, TB)

    V = jnp.asarray(V, jnp.float32)
    weight = jnp.asarray(weight, jnp.float32)
    bias = jnp.asarray(bias, jnp.float32)
    tune = jnp.asarray(tune_weight, jnp.float32)[0]                       # [H, C]
    graph_size = jnp.minimum(jnp.asarray(graph_size, jnp.int32), N)       # clamp oversize
    if B_pad != B:
        V = jnp.pad(V, ((0, B_pad - B), (0, 0), (0, 0)))
        graph_size = jnp.pad(graph_size, (0, B_pad - B))   # padded graphs -> size 0
    gs2d = graph_size.reshape(B_pad, 1)

    # --- fused / padded parameters (built once, outside the kernel) ----------
    #   WT[k, h]    = sum_c weight[k, h*C + c] * tune[h, c]
    #   WT_exp[k, h*C + c] = WT[k, h]   (head-expanded so scores come out of the
    #                                    matmul already broadcast over C columns)
    WT = jnp.einsum('khc,hc->kh', weight.reshape(C, H, C), tune)          # [C, H]
    WT_exp = jnp.repeat(WT, C, axis=1)                                    # [C, HC]
    bT_exp = jnp.repeat(jnp.einsum('hc,hc->h', bias.reshape(H, C), tune), C)  # [HC]

    Wcat = jnp.zeros((C, 2 * L), jnp.float32)
    Wcat = Wcat.at[:, :HC].set(weight).at[:, L:L + HC].set(WT_exp)        # [C, 2L]
    bT_pad = jnp.zeros((1, L), jnp.float32).at[0, :HC].set(bT_exp)
    bias_pad = jnp.zeros((1, L), jnp.float32).at[0, :HC].set(bias)

    kernel = functools.partial(_mhga_kernel, float(alpha))   # python float, not a jax const

    out = pl.pallas_call(
        kernel,
        out_shape=jax.ShapeDtypeStruct((B_pad, L), jnp.float32),
        grid_spec=pltpu.PrefetchScalarGridSpec(
            num_scalar_prefetch=0,
            grid=(B_pad // TB,),
            in_specs=[
                pl.BlockSpec((TB, N, C), lambda i: (i, 0, 0)),   # V tile (TB graphs)
                pl.BlockSpec((TB, 1), lambda i: (i, 0)),         # graph sizes
                pl.BlockSpec((C, 2 * L), lambda i: (0, 0)),      # fused weight
                pl.BlockSpec((1, L), lambda i: (0, 0)),          # score bias (expanded)
                pl.BlockSpec((1, L), lambda i: (0, 0)),          # projection bias
            ],
            out_specs=pl.BlockSpec((TB, L), lambda i: (i, 0)),   # lane-dense output
        ),
        compiler_params=pltpu.CompilerParams(
            # Each step writes a distinct output block -> the batch axis is safely
            # parallel (megacore sharding on v7x; no-op on single-TC chips).
            dimension_semantics=("parallel",)),
    )(V, gs2d, Wcat, bT_pad, bias_pad)

    return out[:B, :HC]


def _reference(V, graph_size, weight, tune_weight, bias, *, n_head, n_feats, alpha=0.2):
    """Pure-JAX reference mirroring the PyTorch forward (concat=True)."""
    outs = []
    for i in range(V.shape[0]):
        vg = V[i, : int(graph_size[i])] @ weight + bias                  # [n_i, H*C]
        vg = vg.reshape(-1, n_head, n_feats)
        a = jnp.sum(tune_weight[0] * vg, axis=-1)                        # [n_i, H]
        a = jnp.where(a > 0, a, alpha * a)
        a = jax.nn.softmax(a, axis=0)                                    # segment softmax
        v = vg * a[:, :, None]
        outs.append(jnp.sum(v, axis=0).reshape(-1))                      # segment sum + concat
    return jnp.stack(outs)


if __name__ == "__main__":
    B, N, C, H = 2, 16, 8, 5
    ALPHA = 0.2
    key = jax.random.PRNGKey(0)
    k1, k2, k3 = jax.random.split(key, 3)

    # Deterministic parameter init (xavier-uniform-style bounds, bias = 0.01).
    w_bound = float(np.sqrt(6.0 / (C + H * C)))
    weight = jax.random.uniform(k1, (C, H * C), jnp.float32, -w_bound, w_bound)
    t_bound = float(np.sqrt(6.0 / (H + C)))
    tune_weight = jax.random.uniform(k2, (1, H, C), jnp.float32, -t_bound, t_bound)
    bias = jnp.full((H * C,), 0.01, jnp.float32)

    V = jax.random.normal(k3, (B, N, C), jnp.float32)
    graph_size = jnp.array([10, 16], dtype=jnp.int32)

    out = multi_head_global_attention(
        V, graph_size, weight, tune_weight, bias,
        n_head=H, n_feats=C, alpha=ALPHA)
    out = jax.block_until_ready(out)

    ref = _reference(V, np.asarray(graph_size), weight, tune_weight, bias,
                     n_head=H, n_feats=C, alpha=ALPHA)
    # Tolerance covers the f32 reassociation from folding (xW+b)@T into x@(W@T)+b@T.
    np.testing.assert_allclose(np.asarray(out), np.asarray(ref), rtol=1e-3, atol=1e-3)

    print("KERNEL_OK")
</pallas_src>

<mosaic_0001>
module attributes {stable_mosaic.version = 11 : i64} {
  func.func @_mhga_kernel(%arg0: i32, %arg1: memref<8x16x8xf32, #tpu.memory_space<vmem>>, %arg2: memref<8x1xi32, #tpu.memory_space<vmem>>, %arg3: memref<8x256xf32, #tpu.memory_space<vmem>>, %arg4: memref<1x128xf32, #tpu.memory_space<vmem>>, %arg5: memref<1x128xf32, #tpu.memory_space<vmem>>, %arg6: memref<8x128xf32, #tpu.memory_space<vmem>>) attributes {dimension_semantics = [#tpu.dimension_semantics<parallel>], iteration_bounds = array<i64: 1>, scalar_prefetch = 0 : i64, scratch_operands = 0 : i64, tpu.core_type = #tpu.core_type<tc>, window_params = [{transform_indices = @transform_0, window_bounds = array<i64: 8, 16, 8>}, {transform_indices = @transform_1, window_bounds = array<i64: 8, 1>}, {pipeline_mode = #tpu.pipeline_mode<synchronous>, transform_indices = @transform_2, window_bounds = array<i64: 8, 256>}, {pipeline_mode = #tpu.pipeline_mode<synchronous>, transform_indices = @transform_3, window_bounds = array<i64: 1, 128>}, {pipeline_mode = #tpu.pipeline_mode<synchronous>, transform_indices = @transform_4, window_bounds = array<i64: 1, 128>}, {transform_indices = @transform_5, window_bounds = array<i64: 8, 128>}]} {
    %c0 = arith.constant 0 : index
    %c0_0 = arith.constant 0 : index
    %c0_1 = arith.constant 0 : index
    %0 = vector.load %arg1[%c0, %c0_0, %c0_1] : memref<8x16x8xf32, #tpu.memory_space<vmem>>, vector<8x16x8xf32>
    %1 = vector.shape_cast %0 : vector<8x16x8xf32> to vector<128x8xf32>
    %c0_2 = arith.constant 0 : index
    %c0_3 = arith.constant 0 : index
    %2 = vector.load %arg3[%c0_2, %c0_3] : memref<8x256xf32, #tpu.memory_space<vmem>>, vector<8x256xf32>
    %cst = arith.constant dense<0.000000e+00> : vector<128x256xf32>
    %3 = tpu.matmul %1, %2, %cst {dimension_numbers = #tpu.dot_dimension_numbers<[1], [0], [0], [1], [0, 0, 1, 1], [], []>} : vector<128x8xf32>, vector<8x256xf32>, vector<128x256xf32> -> vector<128x256xf32>
    %4 = vector.extract_strided_slice %3 {offsets = [0, 0], sizes = [128, 128], strides = [1, 1]} : vector<128x256xf32> to vector<128x128xf32>
    %5 = vector.shape_cast %4 : vector<128x128xf32> to vector<8x16x128xf32>
    %6 = vector.extract_strided_slice %3 {offsets = [0, 128], sizes = [128, 128], strides = [1, 1]} : vector<128x256xf32> to vector<128x128xf32>
    %c0_4 = arith.constant 0 : index
    %c0_5 = arith.constant 0 : index
    %7 = vector.load %arg4[%c0_4, %c0_5] : memref<1x128xf32, #tpu.memory_space<vmem>>, vector<1x128xf32>
    %8 = vector.broadcast %7 : vector<1x128xf32> to vector<128x128xf32>
    %9 = arith.addf %6, %8 : vector<128x128xf32>
    %10 = vector.shape_cast %9 : vector<128x128xf32> to vector<8x16x128xf32>
    %cst_6 = arith.constant 0.000000e+00 : f32
    %11 = vector.broadcast %cst_6 : f32 to vector<8x16x128xf32>
    %12 = arith.cmpf ogt, %10, %11 : vector<8x16x128xf32>
    %cst_7 = arith.constant 2.000000e-01 : f32
    %13 = vector.broadcast %cst_7 : f32 to vector<8x16x128xf32>
    %14 = arith.mulf %13, %10 : vector<8x16x128xf32>
    %15 = arith.select %12, %10, %14 : vector<8x16x128xi1>, vector<8x16x128xf32>
    %c0_8 = arith.constant 0 : index
    %c0_9 = arith.constant 0 : index
    %16 = vector.load %arg2[%c0_8, %c0_9] : memref<8x1xi32, #tpu.memory_space<vmem>>, vector<8x1xi32>
    %17 = tpu.iota {dimensions = array<i32: 1>} : vector<8x16x128xi32>
    %18 = vector.shape_cast %16 : vector<8x1xi32> to vector<8x1x1xi32>
    %19 = vector.broadcast %18 : vector<8x1x1xi32> to vector<8x16x128xi32>
    %20 = arith.cmpi slt, %17, %19 : vector<8x16x128xi32>
    %cst_10 = arith.constant -3.40282347E+38 : f32
    %21 = vector.broadcast %cst_10 : f32 to vector<8x16x128xf32>
    %22 = arith.select %20, %15, %21 : vector<8x16x128xi1>, vector<8x16x128xf32>
    %cst_11 = arith.constant dense<0xFF800000> : vector<8x128xf32>
    %23 = vector.multi_reduction <maximumf>, %22, %cst_11 [1] : vector<8x16x128xf32> to vector<8x128xf32>
    %24 = vector.shape_cast %23 : vector<8x128xf32> to vector<8x1x128xf32>
    %25 = vector.broadcast %24 : vector<8x1x128xf32> to vector<8x16x128xf32>
    %26 = arith.subf %22, %25 : vector<8x16x128xf32>
    %27 = math.exp %26 : vector<8x16x128xf32>
    %cst_12 = arith.constant 0.000000e+00 : f32
    %28 = vector.broadcast %cst_12 : f32 to vector<8x16x128xf32>
    %29 = arith.select %20, %27, %28 : vector<8x16x128xi1>, vector<8x16x128xf32>
    %cst_13 = arith.constant dense<0.000000e+00> : vector<8x128xf32>
    %30 = vector.multi_reduction <add>, %29, %cst_13 [1] : vector<8x16x128xf32> to vector<8x128xf32>
    %31 = vector.shape_cast %30 : vector<8x128xf32> to vector<8x1x128xf32>
    %cst_14 = arith.constant 0.000000e+00 : f32
    %32 = vector.broadcast %cst_14 : f32 to vector<8x1x128xf32>
    %33 = arith.cmpf ogt, %31, %32 : vector<8x1x128xf32>
    %cst_15 = arith.constant 1.000000e+00 : f32
    %34 = vector.broadcast %cst_15 : f32 to vector<8x1x128xf32>
    %35 = arith.select %33, %31, %34 : vector<8x1x128xi1>, vector<8x1x128xf32>
    %cst_16 = arith.constant 1.000000e+00 : f32
    %36 = vector.broadcast %cst_16 : f32 to vector<8x1x128xf32>
    %37 = arith.divf %36, %35 : vector<8x1x128xf32>
    %38 = vector.broadcast %37 : vector<8x1x128xf32> to vector<8x16x128xf32>
    %39 = arith.mulf %29, %38 : vector<8x16x128xf32>
    %40 = arith.mulf %39, %5 : vector<8x16x128xf32>
    %c0_i32 = arith.constant 0 : i32
    %41 = vector.broadcast %c0_i32 : i32 to vector<8x1xi32>
    %42 = arith.cmpi sgt, %16, %41 : vector<8x1xi32>
    %43 = arith.extui %42 : vector<8x1xi1> to vector<8x1xi32>
    %44 = arith.sitofp %43 : vector<8x1xi32> to vector<8x1xf32>
    %cst_17 = arith.constant dense<0.000000e+00> : vector<8x128xf32>
    %45 = vector.multi_reduction <add>, %40, %cst_17 [1] : vector<8x16x128xf32> to vector<8x128xf32>
    %c0_18 = arith.constant 0 : index
    %c0_19 = arith.constant 0 : index
    %46 = vector.load %arg5[%c0_18, %c0_19] : memref<1x128xf32, #tpu.memory_space<vmem>>, vector<1x128xf32>
    %47 = vector.broadcast %44 : vector<8x1xf32> to vector<8x128xf32>
    %48 = vector.broadcast %46 : vector<1x128xf32> to vector<8x128xf32>
    %49 = arith.mulf %47, %48 : vector<8x128xf32>
    %50 = arith.addf %45, %49 : vector<8x128xf32>
    %c0_20 = arith.constant 0 : index
    %c0_21 = arith.constant 0 : index
    %51 = vector.load %arg6[%c0_20, %c0_21] : memref<8x128xf32, #tpu.memory_space<vmem>>, vector<8x128xf32>
    tpu.vector_store %arg6[%c0_20, %c0_21], %50 {strides = array<i32>} : memref<8x128xf32, #tpu.memory_space<vmem>>, vector<8x128xf32>,
    return
  }
  func.func @transform_0(%arg0: i32) -> (i32, i32, i32) {
    %c0_i32 = arith.constant 0 : i32
    %c0_i32_0 = arith.constant 0 : i32
    %c0_i32_1 = arith.constant 0 : i32
    return %arg0, %c0_i32, %c0_i32_0 : i32, i32, i32
  }
  func.func @transform_1(%arg0: i32) -> (i32, i32) {
    %c0_i32 = arith.constant 0 : i32
    %c0_i32_0 = arith.constant 0 : i32
    return %arg0, %c0_i32 : i32, i32
  }
  func.func @transform_2(%arg0: i32) -> (i32, i32) {
    %c0_i32 = arith.constant 0 : i32
    %c0_i32_0 = arith.constant 0 : i32
    %c0_i32_1 = arith.constant 0 : i32
    return %c0_i32, %c0_i32_0 : i32, i32
  }
  func.func @transform_3(%arg0: i32) -> (i32, i32) {
    %c0_i32 = arith.constant 0 : i32
    %c0_i32_0 = arith.constant 0 : i32
    %c0_i32_1 = arith.constant 0 : i32
    return %c0_i32, %c0_i32_0 : i32, i32
  }
  func.func @transform_4(%arg0: i32) -> (i32, i32) {
    %c0_i32 = arith.constant 0 : i32
    %c0_i32_0 = arith.constant 0 : i32
    %c0_i32_1 = arith.constant 0 : i32
    return %c0_i32, %c0_i32_0 : i32, i32
  }
  func.func @transform_5(%arg0: i32) -> (i32, i32) {
    %c0_i32 = arith.constant 0 : i32
    %c0_i32_0 = arith.constant 0 : i32
    return %arg0, %c0_i32 : i32, i32
  }
}

</mosaic_0001>

<bundles_post_ra>
// kernel: tpu_custom_call.1
= control target key start
LH: loop header
LB: loop body
LE: loop exit
PB: predicated region body
PF: predicated region fallthrough
CT: control target
= control target key end

     0   :  { %v321_v2 = vlaneseq  ;;  %vm39_vm0 = vcmask 64512   ;;  %v942_v6 = vmov 1966171168   ;;  %v943_v8 = vmov 0.0   ;;  %s1458_s0 = inlined_call_operand.vmem [shape: f32[8,16,8], index: 0, kind: input, shape index: {}]   ;;  %s1459_s1 = inlined_call_operand.vmem [shape: s32[8,1], index: 1, kind: input, shape index: {}]   ;;  %s1460_s2 = inlined_call_operand.vmem [shape: f32[8,256], index: 2, kind: input, shape index: {}]   ;;  %s1461_s3 = inlined_call_operand.vmem [shape: f32[1,128], index: 3, kind: input, shape index: {}]   ;;  %s1462_s4 = inlined_call_operand.vmem [shape: f32[1,128], index: 4, kind: input, shape index: {}]   ;;  %s1463_s5 = inlined_call_operand.hbm [shape: f32[8,128], index: 5, kind: output, shape index: {}]  }
   0x1   :  { %v38_v0 = vld [vmem:[%s1460_s2 + $0x8] sm:$0xff]  ;;  %v37_v1 = vld [vmem:[%s1460_s2] sm:$0xff]  ;;  %v326_v7 = vunpack.c.l.s4 %v942_v6  ;;  %152 = vmatprep.mubr.f32.mxu0 %v943_v8  ;;  %200 = vmatprep.mubr.f32.mxu1 %v943_v8  ;;  %v944_v12 = vmov 0  }
   0x2   :  { %88 = vmatprep.subr.mxu0 %v38_v0  ;;  %861 = vmatprep.subr.mxu1 %v38_v0  ;;  %v21_v3 = vld [vmem:[%s1458_s0] sm:$0xff]  ;;  %v988_v5 = vshrl.u32 %v321_v2, 7  ;;  %v22_v10 = vld [vmem:[%s1458_s0 + $0x8] sm:$0xff] }
   0x3   :  { %v29_v4 = vld [vmem:[%s1458_s0 + $0x40] sm:$0xff]  ;;  %89 = vmatpush1.msra.mxu0 %v37_v1  ;;  %862 = vmatpush1.msra.mxu1 %v37_v1  ;;  %v327_v9 = vunpack.c.0.s8 %v326_v7  ;;  %v30_v11 = vld [vmem:[%s1458_s0 + $0x48] sm:$0xff] }
   0x4   :  { %842 = vmatmul.mubr.msk.f32.vlgmr.msra.gmra.mrb[0].mxu0 %vm39_vm0, %v21_v3  ;;  %850 = vmatmul.mubr.msk.f32.vlgmr.msra.gmra.mrb[0].mxu1 %vm39_vm0, %v29_v4  ;;  %v1005_v13 = vld [vmem:[%s1459_s1] sm:$0xff] }
   0x5   :  { %158 = vmatprep.mubr.f32.mxu0 %v943_v8  ;;  %206 = vmatprep.mubr.f32.mxu1 %v943_v8  ;;  %v330_v14 = vsub.s32 %v327_v9, %v988_v5 }
   0x6   :  { %867 = vset.pattern.permute.xlu1 %v944_v12  ;;  %868 = vset.pattern.permute.xlu0 %v944_v12 }
   0x7   :  { %10 = vsyncpa [#allocation3], 0  ;;  %v324_v15 = vcombine.high %v1005_v13, %v1005_v13  ;;  %v331_v16 = vrot.slane %v1005_v13, %v330_v14  ;;  %v375_v17 = vsub.s32 0, %v988_v5  ;;  %v23_v18 = vld [vmem:[%s1458_s0 + $0x10] sm:$0xff]  ;;  %v24_v27 = vld [vmem:[%s1458_s0 + $0x18] sm:$0xff]  ;;  %vm701_vm1 = vcmp.gt.s32.totalorder %v1005_v13, 0 }
   0x8   :  { %843 = vmatmul.mubr.msk.f32.gmra.mrb[2].mxu0 %vm39_vm0, %v22_v10  ;;  %851 = vmatmul.mubr.msk.f32.gmra.mrb[2].mxu1 %vm39_vm0, %v30_v11  ;;  %v31_v19 = vld [vmem:[%s1458_s0 + $0x50] sm:$0xff]  ;;  %v32_v28 = vld [vmem:[%s1458_s0 + $0x58] sm:$0xff]  ;;  %v25_v35 = vld [vmem:[%s1458_s0 + $0x20] sm:$0xff]  ;;  %v859_v47 = vsel %vm701_vm1, 1.0, %v943_v8  ;;  %v1088_v57 = vadd.s32 8, %v988_v5 }
   0x9   :  { %164 = vmatprep.mubr.f32.mxu0 %v943_v8  ;;  %212 = vmatprep.mubr.f32.mxu1 %v943_v8  ;;  %v338_v20 = vrot.slane %v324_v15, %v330_v14  ;;  %v347_v21 = vrot.slane %v331_v16, %v330_v14  ;;  %v339_v22 = vcombine.high %v331_v16, %v331_v16  ;;  %v33_v36 = vld [vmem:[%s1458_s0 + $0x60] sm:$0xff]  ;;  %v26_v41 = vld [vmem:[%s1458_s0 + $0x28] sm:$0xff]  ;;  %v27_v45 = vld [vmem:[%s1458_s0 + $0x30] sm:$0xff] }
   0xa   :  { %v34_v42 = vld [vmem:[%s1458_s0 + $0x68] sm:$0xff]  ;;  %v35_v46 = vld [vmem:[%s1458_s0 + $0x70] sm:$0xff]  ;;  %v28_v48 = vld [vmem:[%s1458_s0 + $0x38] sm:$0xff] }
   0xb   :  { %v354_v23 = vrot.slane %v338_v20, %v330_v14  ;;  %v340_v24 = vcombine.high %v338_v20, %v338_v20  ;;  %v376_v25 = vrot.slane %v347_v21, %v375_v17  ;;  %v361_v26 = vrot.slane %v339_v22, %v330_v14  ;;  %v36_v49 = vld [vmem:[%s1458_s0 + $0x78] sm:$0xff]  ;;  %v1079_v50 = vld [vmem:[%s1461_s3] ss:$0 sm:$0xff] }
   0xc   :  { %844 = vmatmul.mubr.msk.f32.gmra.mrb[4].mxu0 %vm39_vm0, %v23_v18  ;;  %852 = vmatmul.mubr.msk.f32.gmra.mrb[4].mxu1 %vm39_vm0, %v31_v19  ;;  %v369_v32 = vcombine.high %v347_v21, %v347_v21 }
   0xd   :  { %170 = vmatprep.mubr.f32.mxu0 %v943_v8  ;;  %218 = vmatprep.mubr.f32.mxu1 %v943_v8  ;;  %v392_v29 = vrot.slane %v354_v23, %v375_v17  ;;  %v368_v30 = vrot.slane %v340_v24, %v330_v14  ;;  %v371_v31 = vcombine.high %v361_v26, %v361_v26 }
   0xe   :  { %406 = vperm.xlu1 %867, %v376_v25   ;;  %v380_v33 = vrot.slane %v361_v26, %v375_v17  ;;  %v370_v39 = vcombine.high %v354_v23, %v354_v23  ;;  %v384_v40 = vrot.slane %v369_v32, %v375_v17 }
   0xf   :  { %418 = vperm.xlu0 %868, %v392_v29   ;;  %v396_v34 = vrot.slane %v368_v30, %v375_v17  ;;  %v388_v37 = vrot.slane %v371_v31, %v375_v17  ;;  %v372_v38 = vcombine.high %v368_v30, %v368_v30 }
  0x10   :  { %845 = vmatmul.mubr.msk.f32.gmra.mrb[6].mxu0 %vm39_vm0, %v24_v27  ;;  %853 = vmatmul.mubr.msk.f32.gmra.mrb[6].mxu1 %vm39_vm0, %v32_v28  ;;  %v400_v44 = vrot.slane %v370_v39, %v375_v17 }
  0x11   :  { %176 = vmatprep.mubr.f32.mxu0 %v943_v8  ;;  %224 = vmatprep.mubr.f32.mxu1 %v943_v8  ;;  %v404_v43 = vrot.slane %v372_v38, %v375_v17 }
  0x12   :  { %421 = vperm.xlu1 %867, %v396_v34  }
  0x13   :  { %409 = vperm.xlu0 %868, %v380_v33  }
  0x14   :  { %846 = vmatmul.mubr.msk.f32.gmra.mrb[8].mxu0 %vm39_vm0, %v25_v35  ;;  %854 = vmatmul.mubr.msk.f32.gmra.mrb[8].mxu1 %vm39_vm0, %v33_v36 }
  0x15   :  { %182 = vmatprep.mubr.f32.mxu0 %v943_v8  ;;  %230 = vmatprep.mubr.f32.mxu1 %v943_v8 }
  0x16   :  { %415 = vperm.xlu1 %867, %v388_v37  }
  0x17   :  { %412 = vperm.xlu0 %868, %v384_v40  }
  0x18   :  { %847 = vmatmul.mubr.msk.f32.gmra.mrb[10].mxu0 %vm39_vm0, %v26_v41  ;;  %855 = vmatmul.mubr.msk.f32.gmra.mrb[10].mxu1 %vm39_vm0, %v34_v42 }
  0x19   :  { %188 = vmatprep.mubr.f32.mxu0 %v943_v8  ;;  %236 = vmatprep.mubr.f32.mxu1 %v943_v8 }
  0x1a   :  { %427 = vperm.xlu1 %867, %v404_v43  }
  0x1b   :  { %424 = vperm.xlu0 %868, %v400_v44  }
  0x1c   :  { %848 = vmatmul.mubr.msk.f32.gmra.mrb[12].mxu0 %vm39_vm0, %v27_v45  ;;  %856 = vmatmul.mubr.msk.f32.gmra.mrb[12].mxu1 %vm39_vm0, %v35_v46 }
  0x1d   :  { %194 = vmatprep.mubr.f32.mxu0 %v943_v8  ;;  %242 = vmatprep.mubr.f32.mxu1 %v943_v8 }
  0x1f   :  { %763 = vperm.xlu0 %868, %v859_v47  }
  0x20   :  { %849 = vmatmul.mubr.msk.f32.gmra.mrb[14].mxu0 %vm39_vm0, %v28_v48  ;;  %857 = vmatmul.mubr.msk.f32.gmra.mrb[14].mxu1 %vm39_vm0, %v36_v49 }
  0x8d   :  { %v1090_v58 = vpop.permute.xlu1 %406 }
  0x8e   :  { %v1092_v59 = vpop.permute.xlu0 %418  ;;  %vm429_vm4 = vcmp.lt.s32.totalorder %v988_v5, %v1090_v58  ;;  %vm430_vm6 = vcmp.lt.s32.totalorder %v1088_v57, %v1090_v58 }
  0x8f   :  { %vm437_vm5 = vcmp.lt.s32.totalorder %v988_v5, %v1092_v59  ;;  %vm438_vm7 = vcmp.lt.s32.totalorder %v1088_v57, %v1092_v59 }
  0x91   :  { %v1114_v12 = vpop.permute.xlu1 %421 }
  0x92   :  { %v1112_v11 = vpop.permute.xlu0 %409  ;;  %vm439_vm10 = vcmp.lt.s32.totalorder %v988_v5, %v1114_v12  ;;  %vm440_vm11 = vcmp.lt.s32.totalorder %v1088_v57, %v1114_v12 }
  0x93   :  { %vm431_vm14 = vcmp.lt.s32.totalorder %v988_v5, %v1112_v11  ;;  %vm432_vm15 = vcmp.lt.s32.totalorder %v1088_v57, %v1112_v11 }
  0x96   :  { %v1156_v37 = vpop.permute.xlu0 %412 }
  0xd7   :  { %v1081_v51 = vpop.f32.mrb[0].mxu0  ;;  %v1083_v52 = vpop.f32.mrb[0].mxu1 }
  0xd8   :  { %v156_v53 = vpop.f32.mrb[1].mxu0  ;;  %v204_v54 = vpop.f32.mrb[1].mxu1 }
  0xd9   :  { %v256_v55 = vadd.f32 %v1079_v50, %v156_v53  ;;  %v264_v56 = vadd.f32 %v1079_v50, %v204_v54 }
  0xdb   :  { %vm272_vm2 = vcmp.gt.f32.partialorder %v256_v55, 0.0  ;;  %v288_v60 = vmul.f32 0.2, %v256_v55  ;;  %vm280_vm3 = vcmp.gt.f32.partialorder %v264_v56, 0.0  ;;  %v296_v61 = vmul.f32 0.2, %v264_v56 }
  0xdc   :  { %v1094_v62 = vpop.f32.mrb[2].mxu0  ;;  %v1096_v63 = vpop.f32.mrb[2].mxu1 }
  0xdd   :  { %v162_v0 = vpop.f32.mrb[3].mxu0  ;;  %v210_v1 = vpop.f32.mrb[3].mxu1  ;;  %v304_v2 = vsel %vm272_vm2, %v256_v55, %v288_v60  ;;  %v312_v6 = vsel %vm280_vm3, %v264_v56, %v296_v61  ;;  %vm433_vm2 = vcmp.lt.s32.totalorder %v988_v5, %v1156_v37  ;;  %vm1466_vm3 = vcmp.lt.s32.totalorder %v1088_v57, %v1156_v37 }
  0xde   :  { %v257_v3 = vadd.f32 %v1079_v50, %v162_v0  ;;  %v265_v4 = vadd.f32 %v1079_v50, %v210_v1  ;;  %v1119_v13 = vsel %vm429_vm4, %v304_v2, -3.4028235e+38  ;;  %v1124_v14 = vsel %vm437_vm5, %v312_v6, -3.4028235e+38 }
  0xdf   :  { %v1108_v7 = vpop.f32.mrb[4].mxu0  ;;  %v1110_v8 = vpop.f32.mrb[4].mxu1 }
  0xe0   :  { %vm273_vm8 = vcmp.gt.f32.partialorder %v257_v3, 0.0  ;;  %v289_v9 = vmul.f32 0.2, %v257_v3  ;;  %vm281_vm9 = vcmp.gt.f32.partialorder %v265_v4, 0.0  ;;  %v297_v10 = vmul.f32 0.2, %v265_v4 }
  0xe1   :  { %v168_v15 = vpop.f32.mrb[5].mxu0  ;;  %v216_v16 = vpop.f32.mrb[5].mxu1 }
  0xe2   :  { %v305_v17 = vsel %vm273_vm8, %v257_v3, %v289_v9  ;;  %v313_v18 = vsel %vm281_vm9, %v265_v4, %v297_v10  ;;  %v258_v19 = vadd.f32 %v1079_v50, %v168_v15  ;;  %v266_v20 = vadd.f32 %v1079_v50, %v216_v16 }
  0xe3   :  { %v1131_v21 = vsel %vm430_vm6, %v305_v17, -3.4028235e+38  ;;  %v1136_v22 = vsel %vm438_vm7, %v313_v18, -3.4028235e+38  ;;  %v1138_v23 = vpop.f32.mrb[6].mxu0  ;;  %v1140_v24 = vpop.f32.mrb[6].mxu1 }
  0xe4   :  { %v461_v25 = vmax.f32 %v1119_v13, %v1131_v21  ;;  %v489_v26 = vmax.f32 %v1124_v14, %v1136_v22  ;;  %vm274_vm12 = vcmp.gt.f32.partialorder %v258_v19, 0.0  ;;  %v290_v27 = vmul.f32 0.2, %v258_v19  ;;  %v174_v28 = vpop.f32.mrb[7].mxu0  ;;  %v222_v29 = vpop.f32.mrb[7].mxu1 }
  0xe5   :  { %vm282_vm13 = vcmp.gt.f32.partialorder %v266_v20, 0.0  ;;  %v298_v30 = vmul.f32 0.2, %v266_v20  ;;  %v259_v31 = vadd.f32 %v1079_v50, %v174_v28  ;;  %v267_v32 = vadd.f32 %v1079_v50, %v222_v29 }
  0xe6   :  { %v462_v33 = vrot.slane %v461_v25, 4  ;;  %v490_v34 = vrot.slane %v489_v26, 4  ;;  %v306_v35 = vsel %vm274_vm12, %v258_v19, %v290_v27 }
  0xe7   :  { %vm275_vm0 = vcmp.gt.f32.partialorder %v259_v31, 0.0  ;;  %v291_v36 = vmul.f32 0.2, %v259_v31  ;;  %vm283_vm1 = vcmp.gt.f32.partialorder %v267_v32, 0.0  ;;  %v299_v40 = vmul.f32 0.2, %v267_v32 }
  0xe8   :  { %v463_v38 = vmax.f32 %v461_v25, %v462_v33  ;;  %v491_v39 = vmax.f32 %v489_v26, %v490_v34  ;;  %v314_v41 = vsel %vm282_vm13, %v266_v20, %v298_v30  ;;  %v1159_v42 = vpop.f32.mrb[8].mxu0  ;;  %v1161_v43 = vpop.f32.mrb[8].mxu1  ;;  %v1166_v44 = vsel %vm431_vm14, %v306_v35, -3.4028235e+38 }
  0xe9   :  { %v307_v45 = vsel %vm275_vm0, %v259_v31, %v291_v36  ;;  %v1171_v46 = vsel %vm439_vm10, %v314_v41, -3.4028235e+38  ;;  %v180_v47 = vpop.f32.mrb[9].mxu0  ;;  %v228_v48 = vpop.f32.mrb[9].mxu1  ;;  %v315_v55 = vsel %vm283_vm1, %v267_v32, %v299_v40 }
  0xea   :  { %v464_v49 = vrot.slane %v463_v38, 2  ;;  %v492_v53 = vrot.slane %v491_v39, 2  ;;  %v1176_v54 = vsel %vm432_vm15, %v307_v45, -3.4028235e+38  ;;  %v1184_v60 = vsel %vm440_vm11, %v315_v55, -3.4028235e+38  ;;  %v1198_v20 = vpop.permute.xlu0 %424 }
  0xeb   :  { %v468_v56 = vmax.f32 %v1166_v44, %v1176_v54  ;;  %v260_v61 = vadd.f32 %v1079_v50, %v180_v47  ;;  %v268_v0 = vadd.f32 %v1079_v50, %v228_v48  ;;  %v1188_v1 = vpop.f32.mrb[10].mxu0  ;;  %v1190_v2 = vpop.f32.mrb[10].mxu1  ;;  %v496_v6 = vmax.f32 %v1171_v46, %v1184_v60 }
  0xec   :  { %v465_v3 = vmax.f32 %v463_v38, %v464_v49  ;;  %v493_v4 = vmax.f32 %v491_v39, %v492_v53  ;;  %v186_v9 = vpop.f32.mrb[11].mxu0  ;;  %v234_v10 = vpop.f32.mrb[11].mxu1  ;;  %vm1465_vm12 = vcmp.lt.s32.totalorder %v988_v5, %v1198_v20  ;;  %vm1464_vm13 = vcmp.lt.s32.totalorder %v1088_v57, %v1198_v20 }
  0xed   :  { %v469_v15 = vrot.slane %v468_v56, 4  ;;  %vm276_vm8 = vcmp.gt.f32.partialorder %v260_v61, 0.0  ;;  %v292_v16 = vmul.f32 0.2, %v260_v61  ;;  %v497_v19 = vrot.slane %v496_v6, 4 }
  0xee   :  { %v466_v17 = vrot.slane %v465_v3, 1  ;;  %v494_v18 = vrot.slane %v493_v4, 1  ;;  %vm284_vm9 = vcmp.gt.f32.partialorder %v268_v0, 0.0  ;;  %v300_v27 = vmul.f32 0.2, %v268_v0 }
  0xef   :  { %v470_v25 = vmax.f32 %v468_v56, %v469_v15  ;;  %v308_v26 = vsel %vm276_vm8, %v260_v61, %v292_v16  ;;  %v261_v28 = vadd.f32 %v1079_v50, %v186_v9  ;;  %v1205_v29 = vpop.f32.mrb[12].mxu0  ;;  %v1207_v30 = vpop.f32.mrb[12].mxu1  ;;  %v498_v33 = vmax.f32 %v496_v6, %v497_v19 }
  0xf0   :  { %v467_v31 = vmax.f32 %v465_v3, %v466_v17  ;;  %v495_v32 = vmax.f32 %v493_v4, %v494_v18  ;;  %v269_v34 = vadd.f32 %v1079_v50, %v234_v10  ;;  %v192_v35 = vpop.f32.mrb[13].mxu0  ;;  %v240_v36 = vpop.f32.mrb[13].mxu1  ;;  %v1213_v39 = vsel %vm433_vm2, %v308_v26, -3.4028235e+38 }
  0xf1   :  { %v471_v38 = vrot.slane %v470_v25, 2  ;;  %vm277_vm0 = vcmp.gt.f32.partialorder %v261_v28, 0.0  ;;  %v293_v40 = vmul.f32 0.2, %v261_v28  ;;  %v499_v53 = vrot.slane %v498_v33, 2 }
  0xf2   :  { %v517_v41 = vsub.f32 %v1119_v13, %v467_v31  ;;  %v518_v45 = vsub.f32 %v1131_v21, %v467_v31  ;;  %v525_v47 = vsub.f32 %v1124_v14, %v495_v32  ;;  %v526_v48 = vsub.f32 %v1136_v22, %v495_v32  ;;  %v1225_v14 = vpop.permute.xlu1 %415 }
  0xf3   :  { %v472_v49 = vmax.f32 %v470_v25, %v471_v38  ;;  %v316_v55 = vsel %vm284_vm9, %v268_v0, %v300_v27  ;;  %v309_v56 = vsel %vm277_vm0, %v261_v28, %v293_v40  ;;  %v1220_v61 = vpop.f32.mrb[14].mxu0  ;;  %v1222_v3 = vpop.f32.mrb[14].mxu1  ;;  %v262_v13 = vadd.f32 %v1079_v50, %v192_v35 }
  0xf4   :  { %v533_v4 = vmul.f32 1.442695, %v517_v41  ;;  %v535_v6 = vmul.f32 1.442695, %v518_v45  ;;  %v549_v9 = vmul.f32 1.442695, %v525_v47  ;;  %v500_v15 = vmax.f32 %v498_v33, %v499_v53 }
  0xf5   :  { %v551_v10 = vmul.f32 1.442695, %v526_v48  ;;  %v473_v21 = vrot.slane %v472_v49, 1  ;;  %v1230_v22 = vsel %vm1466_vm3, %v309_v56, -3.4028235e+38  ;;  %v198_v0 = vpop.f32.mrb[15].mxu0  ;;  %vm435_vm9 = vcmp.lt.s32.totalorder %v988_v5, %v1225_v14 }
  0xf6   :  { %870 = vpow2.f32 %v533_v4  ;;  %v475_v16 = vmax.f32 %v1213_v39, %v1230_v22  ;;  %vm285_vm1 = vcmp.gt.f32.partialorder %v269_v34, 0.0  ;;  %v301_v17 = vmul.f32 0.2, %v269_v34  ;;  %v246_v18 = vpop.f32.mrb[15].mxu1  ;;  %v1249_v47 = vpop.permute.xlu1 %427 }
  0xf7   :  { %872 = vpow2.f32 %v535_v6  ;;  %v474_v19 = vmax.f32 %v472_v49, %v473_v21  ;;  %v501_v25 = vrot.slane %v500_v15, 1  ;;  %vm278_vm8 = vcmp.gt.f32.partialorder %v262_v13, 0.0 }
  0xf8   :  { %874 = vpow2.f32 %v549_v9  ;;  %v476_v26 = vrot.slane %v475_v16, 4  ;;  %v317_v27 = vsel %vm285_vm1, %v269_v34, %v301_v17  ;;  %v294_v28 = vmul.f32 0.2, %v262_v13 }
  0xf9   :  { %876 = vpow2.f32 %v551_v10  ;;  %v519_v31 = vsub.f32 %v1166_v44, %v474_v19  ;;  %v520_v32 = vsub.f32 %v1176_v54, %v474_v19  ;;  %v502_v33 = vmax.f32 %v500_v15, %v501_v25 }
  0xfa   :  { %v1239_v35 = vsel %vm1465_vm12, %v316_v55, -3.4028235e+38  ;;  %v477_v38 = vmax.f32 %v475_v16, %v476_v26  ;;  %v1244_v40 = vsel %vm1464_vm13, %v317_v27, -3.4028235e+38  ;;  %v270_v34 = vadd.f32 %v1079_v50, %v240_v36 }
  0xfb   :  { %v537_v41 = vmul.f32 1.442695, %v519_v31  ;;  %v539_v45 = vmul.f32 1.442695, %v520_v32  ;;  %v527_v44 = vsub.f32 %v1171_v46, %v502_v33  ;;  %v528_v54 = vsub.f32 %v1184_v60, %v502_v33 }
  0xfc   :  { %v478_v48 = vrot.slane %v477_v38, 2  ;;  %v503_v49 = vmax.f32 %v1239_v35, %v1244_v40  ;;  %v310_v53 = vsel %vm278_vm8, %v262_v13, %v294_v28  ;;  %vm436_vm0 = vcmp.lt.s32.totalorder %v1088_v57, %v1225_v14 }
  0xfd   :  { %878 = vpow2.f32 %v537_v41  ;;  %v553_v55 = vmul.f32 1.442695, %v527_v44  ;;  %v555_v36 = vmul.f32 1.442695, %v528_v54  ;;  %vm443_vm1 = vcmp.lt.s32.totalorder %v988_v5, %v1249_v47 }
  0xfe   :  { %880 = vpow2.f32 %v539_v45  ;;  %v479_v46 = vmax.f32 %v477_v38, %v478_v48  ;;  %v504_v60 = vrot.slane %v503_v49, 4  ;;  %vm444_vm13 = vcmp.lt.s32.totalorder %v1088_v57, %v1249_v47 }
  0xff   :  { %v263_v56 = vadd.f32 %v1079_v50, %v198_v0  ;;  %882 = vpow2.f32 %v553_v55  ;;  %v1266_v4 = vsel %vm435_vm9, %v310_v53, -3.4028235e+38  ;;  %v302_v6 = vmul.f32 0.2, %v270_v34 }
 0x100   :  { %v271_v9 = vadd.f32 %v1079_v50, %v246_v18  ;;  %v871_v13 = vpop.eup %870  ;;  %884 = vpow2.f32 %v555_v36  ;;  %v480_v10 = vrot.slane %v479_v46, 1  ;;  %v505_v21 = vmax.f32 %v503_v49, %v504_v60 }
 0x101   :  { %vm286_vm8 = vcmp.gt.f32.partialorder %v270_v34, 0.0  ;;  %v873_v15 = vpop.eup %872  ;;  %v1272_v16 = vsel %vm429_vm4, %v871_v13, 0.0  ;;  %vm279_vm12 = vcmp.gt.f32.partialorder %v263_v56, 0.0  ;;  %v295_v0 = vmul.f32 0.2, %v263_v56 }
 0x102   :  { %vm287_vm3 = vcmp.gt.f32.partialorder %v271_v9, 0.0  ;;  %v875_v17 = vpop.eup %874  ;;  %v1277_v19 = vsel %vm430_vm6, %v873_v15, 0.0  ;;  %v481_v50 = vmax.f32 %v479_v46, %v480_v10  ;;  %v506_v18 = vrot.slane %v505_v21, 2 }
 0x103   :  { %v303_v25 = vmul.f32 0.2, %v271_v9  ;;  %v877_v26 = vpop.eup %876  ;;  %v581_v27 = vadd.f32 %v1277_v19, %v1272_v16  ;;  %v1284_v28 = vsel %vm437_vm5, %v875_v17, 0.0  ;;  %v318_v31 = vsel %vm286_vm8, %v270_v34, %v302_v6 }
 0x104   :  { %v311_v32 = vsel %vm279_vm12, %v263_v56, %v295_v0  ;;  %v1289_v58 = vsel %vm438_vm7, %v877_v26, 0.0  ;;  %v521_v33 = vsub.f32 %v1213_v39, %v481_v50  ;;  %v522_v38 = vsub.f32 %v1230_v22, %v481_v50 }
 0x105   :  { %v507_v41 = vmax.f32 %v505_v21, %v506_v18  ;;  %v582_v45 = vrot.slane %v581_v27, 4  ;;  %v609_v44 = vadd.f32 %v1289_v58, %v1284_v28  ;;  %v1298_v54 = vsel %vm436_vm0, %v311_v32, -3.4028235e+38 }
 0x106   :  { %v319_v34 = vsel %vm287_vm3, %v271_v9, %v303_v25  ;;  %v541_v48 = vmul.f32 1.442695, %v521_v33  ;;  %v543_v59 = vmul.f32 1.442695, %v522_v38  ;;  %v482_v39 = vmax.f32 %v1266_v4, %v1298_v54 }
 0x107   :  { %v508_v49 = vrot.slane %v507_v41, 1  ;;  %v879_v53 = vpop.eup %878  ;;  %v583_v22 = vadd.f32 %v582_v45, %v581_v27  ;;  %v610_v55 = vrot.slane %v609_v44, 4  ;;  %v1306_v36 = vsel %vm443_vm1, %v318_v31, -3.4028235e+38 }
 0x108   :  { %v1311_v46 = vsel %vm444_vm13, %v319_v34, -3.4028235e+38  ;;  %v881_v60 = vpop.eup %880  ;;  %v1316_v56 = vsel %vm431_vm14, %v879_v53, 0.0  ;;  %886 = vpow2.f32 %v541_v48  ;;  %v483_v9 = vrot.slane %v482_v39, 4 }
 0x109   :  { %v509_v6 = vmax.f32 %v507_v41, %v508_v49  ;;  %v883_v13 = vpop.eup %882  ;;  %v584_v10 = vrot.slane %v583_v22, 2  ;;  %v611_v21 = vadd.f32 %v610_v55, %v609_v44  ;;  %v1321_v15 = vsel %vm432_vm15, %v881_v60, 0.0 }
 0x10a   :  { %888 = vpow2.f32 %v543_v59  ;;  %v885_v0 = vpop.eup %884  ;;  %v588_v17 = vadd.f32 %v1321_v15, %v1316_v56  ;;  %v1328_v50 = vsel %vm439_vm10, %v883_v13, 0.0  ;;  %v484_v31 = vmax.f32 %v482_v39, %v483_v9 }
 0x10b   :  { %v529_v18 = vsub.f32 %v1239_v35, %v509_v6  ;;  %v530_v25 = vsub.f32 %v1244_v40, %v509_v6  ;;  %v585_v26 = vadd.f32 %v584_v10, %v583_v22  ;;  %v612_v27 = vrot.slane %v611_v21, 2 }
 0x10c   :  { %v1335_v11 = vsel %vm440_vm11, %v885_v0, 0.0  ;;  %v589_v32 = vrot.slane %v588_v17, 4  ;;  %v485_v34 = vrot.slane %v484_v31, 2  ;;  %v510_v35 = vmax.f32 %v1306_v36, %v1311_v46 }
 0x10d   :  { %v616_v33 = vadd.f32 %v1335_v11, %v1328_v50  ;;  %v557_v38 = vmul.f32 1.442695, %v529_v18  ;;  %v559_v41 = vmul.f32 1.442695, %v530_v25  ;;  %v586_v45 = vrot.slane %v585_v26, 1 }
 0x10e   :  { %v613_v44 = vadd.f32 %v612_v27, %v611_v21  ;;  %v590_v40 = vadd.f32 %v589_v32, %v588_v17  ;;  %v486_v49 = vmax.f32 %v484_v31, %v485_v34  ;;  %v511_v22 = vrot.slane %v510_v35, 4 }
 0x10f   :  { %v617_v48 = vrot.slane %v616_v33, 4  ;;  %890 = vpow2.f32 %v557_v38  ;;  %v587_v59 = vadd.f32 %v586_v45, %v585_v26  ;;  %vm1467_vm6 = vcmp.lt.s32.totalorder %v1088_v57, %v1156_v37 }
 0x110   :  { %v614_v12 = vrot.slane %v613_v44, 1  ;;  %892 = vpow2.f32 %v559_v41  ;;  %v591_v39 = vrot.slane %v590_v40, 2  ;;  %v487_v60 = vrot.slane %v486_v49, 1 }
 0x111   :  { %v618_v53 = vadd.f32 %v617_v48, %v616_v33  ;;  %vm637_vm4 = vcmp.gt.f32.partialorder %v587_v59, 0.0  ;;  %v512_v21 = vmax.f32 %v510_v35, %v511_v22  ;;  %vm1468_vm10 = vcmp.lt.s32.totalorder %v988_v5, %v1198_v20 }
 0x112   :  { %v615_v55 = vadd.f32 %v614_v12, %v613_v44  ;;  %v887_v6 = vpop.eup %886  ;;  %v645_v9 = vsel %vm637_vm4, %v587_v59, 1.0  ;;  %v592_v13 = vadd.f32 %v591_v39, %v590_v40  ;;  %v488_v18 = vmax.f32 %v486_v49, %v487_v60 }
 0x113   :  { %v619_v10 = vrot.slane %v618_v53, 2  ;;  %894 = vrcp.f32 %v645_v9  ;;  %v1344_v17 = vsel %vm433_vm2, %v887_v6, 0.0  ;;  %v513_v44 = vrot.slane %v512_v21, 2 }
 0x114   :  { %v889_v0 = vpop.eup %888  ;;  %vm641_vm5 = vcmp.gt.f32.partialorder %v615_v55, 0.0  ;;  %v593_v26 = vrot.slane %v592_v13, 1  ;;  %v523_v33 = vsub.f32 %v1266_v4, %v488_v18  ;;  %v524_v38 = vsub.f32 %v1298_v54, %v488_v18 }
 0x115   :  { %v649_v25 = vsel %vm641_vm5, %v615_v55, 1.0  ;;  %v620_v27 = vadd.f32 %v619_v10, %v618_v53  ;;  %v1349_v31 = vsel %vm1467_vm6, %v889_v0, 0.0  ;;  %v514_v37 = vmax.f32 %v512_v21, %v513_v44 }
 0x116   :  { %896 = vrcp.f32 %v649_v25  ;;  %v595_v32 = vadd.f32 %v1349_v31, %v1344_v17  ;;  %v594_v41 = vadd.f32 %v593_v26, %v592_v13  ;;  %v545_v35 = vmul.f32 1.442695, %v523_v33 }
 0x117   :  { %v621_v45 = vrot.slane %v620_v27, 1  ;;  %v547_v40 = vmul.f32 1.442695, %v524_v38  ;;  %vm1469_vm14 = vcmp.lt.s32.totalorder %v1088_v57, %v1198_v20  ;;  %v515_v54 = vrot.slane %v514_v37, 1 }
 0x118   :  { %v596_v34 = vrot.slane %v595_v32, 4  ;;  %vm638_vm7 = vcmp.gt.f32.partialorder %v594_v41, 0.0  ;;  %898 = vpow2.f32 %v545_v35  ;;  %vm806_vm12 = vcmask 1041409  }
 0x119   :  { %v891_v48 = vpop.eup %890  ;;  %v622_v59 = vadd.f32 %v621_v45, %v620_v27  ;;  %v646_v49 = vsel %vm638_vm7, %v594_v41, 1.0  ;;  %v516_v6 = vmax.f32 %v514_v37, %v515_v54  ;;  %vm818_vm8 = vcmask 1045509  }
 0x11a   :  { %v893_v12 = vpop.eup %892  ;;  %v597_v39 = vadd.f32 %v596_v34, %v595_v32  ;;  %v1358_v53 = vsel %vm1468_vm10, %v891_v48, 0.0  ;;  %900 = vrcp.f32 %v646_v49  ;;  %vm821_vm4 = vcmask 1046534  }
 0x11b   :  { %vm642_vm11 = vcmp.gt.f32.partialorder %v622_v59, 0.0  ;;  %v1363_v4 = vsel %vm1469_vm14, %v893_v12, 0.0  ;;  %902 = vpow2.f32 %v547_v40  ;;  %v531_v20 = vsub.f32 %v1306_v36, %v516_v6 }
 0x11c   :  { %v650_v22 = vsel %vm642_vm11, %v622_v59, 1.0  ;;  %v598_v55 = vrot.slane %v597_v39, 2  ;;  %v623_v60 = vadd.f32 %v1363_v4, %v1358_v53  ;;  %v532_v18 = vsub.f32 %v1311_v46, %v516_v6 }
 0x11d   :  { %904 = vrcp.f32 %v650_v22  ;;  %v895_v9 = vpop.eup %894  ;;  %vm824_vm5 = vcmask 1047559  }
 0x11e   :  { %v599_v13 = vadd.f32 %v598_v55, %v597_v39  ;;  %v624_v10 = vrot.slane %v623_v60, 4  ;;  %v669_v21 = vmul.f32 %v895_v9, %v1272_v16  ;;  %v670_v0 = vmul.f32 %v895_v9, %v1277_v19 }
 0x11f   :  { %v561_v16 = vmul.f32 1.442695, %v531_v20  ;;  %v563_v46 = vmul.f32 1.442695, %v532_v18  ;;  %v860_v18 = vld [vmem:[%s1462_s4] ss:$0 sm:$0xff] }
 0x120   :  { %v897_v25 = vpop.eup %896  ;;  %v600_v26 = vrot.slane %v599_v13, 1  ;;  %v625_v27 = vadd.f32 %v624_v10, %v623_v60  ;;  %v685_v32 = vmul.f32 %v669_v21, %v1081_v51  ;;  %v686_v33 = vmul.f32 %v670_v0, %v1094_v62  ;;  %s945_s4 = smov [#allocation2]  }
 0x121   :  { %v677_v38 = vmul.f32 %v897_v25, %v1284_v28  ;;  %v678_v41 = vmul.f32 %v897_v25, %v1289_v58  ;;  %906 = vpow2.f32 %v561_v16  ;;  %v764_v25 = vpop.permute.xlu0 %763  ;;  %s834_s30 = sshll.u32 %s945_s4, 4  ;;  %s835_s30 = int_to_ptr.vmem [resolvable:$true] %s834_s30 }
 0x122   :  { %v601_v45 = vadd.f32 %v600_v26, %v599_v13  ;;  %v626_v44 = vrot.slane %v625_v27, 2  ;;  %v704_v34 = vadd.f32 %v686_v33, %v685_v32  ;;  %v899_v35 = vpop.eup %898  ;;  %s918_s1 = scalar_lea.vmem %s835_s30, 128  ;;  %p923_p1 = scmp.lt.s32.totalorder %s835_s30, %s835_s30 }
 0x123   :  { %v693_v19 = vmul.f32 %v677_v38, %v1083_v52  ;;  %v694_v36 = vmul.f32 %v678_v41, %v1096_v63  ;;  %v1382_v58 = vsel %vm435_vm9, %v899_v35, 0.0  ;;  %vm809_vm9 = vcmask 1042434   ;;  %p919_p0 = scmp.ne.s32.totalorder %s835_s30, %s918_s1  ;;  %p924_p2 = scmp.lt.s32.totalorder %s918_s1, %s918_s1 }
 0x124   :  { %vm639_vm15 = vcmp.gt.f32.partialorder %v601_v45, 0.0  ;;  %v627_v40 = vadd.f32 %v626_v44, %v625_v27  ;;  %v901_v51 = vpop.eup %900  ;;  %v705_v48 = vrot.slane %v704_v34, 4 }
 0x125   :  { %v1377_v62 = vadd.f32 %v694_v36, %v693_v19  ;;  %v647_v28 = vsel %vm639_vm15, %v601_v45, 1.0  ;;  %v903_v59 = vpop.eup %902  ;;  %v671_v52 = vmul.f32 %v901_v51, %v1316_v56  ;;  %v672_v63 = vmul.f32 %v901_v51, %v1321_v15  ;;  %p925_p3 = por %p924_p2, %p923_p1 }
 0x126   :  { %908 = vrcp.f32 %v647_v28  ;;  %v628_v37 = vrot.slane %v627_v40, 1  ;;  %v1389_v49 = vsel %vm436_vm0, %v903_v59, 0.0  ;;  %v706_v39 = vadd.f32 %v705_v48, %v704_v34 }
 0x127   :  { %v905_v12 = vpop.eup %904  ;;  %910 = vpow2.f32 %v563_v46  ;;  %v687_v54 = vmul.f32 %v671_v52, %v1108_v7  ;;  %v688_v22 = vmul.f32 %v672_v63, %v1138_v23  ;;  %v602_v15 = vadd.f32 %v1389_v49, %v1382_v58  ;;  %p926_p4 = pnand %p925_p3, %p919_p0 }
 0x128   :  { %v679_v55 = vmul.f32 %v905_v12, %v1328_v50  ;;  %v680_v56 = vmul.f32 %v905_v12, %v1335_v11  ;;  %v629_v60 = vadd.f32 %v628_v37, %v627_v40  ;;  %v707_v13 = vrot.slane %v706_v39, 2 }
 0x129   :  { %v711_v6 = vadd.f32 %v688_v22, %v687_v54  ;;  %v603_v10 = vrot.slane %v602_v15, 4  ;;  %v1411_v45 = vmul.f32 %v860_v18, %v764_v25  ;;  %vm812_vm0 = vcmask 1043459  }
 0x12a   :  { %v695_v9 = vmul.f32 %v679_v55, %v1110_v8  ;;  %v696_v14 = vmul.f32 %v680_v56, %v1140_v24  ;;  %vm643_vm2 = vcmp.gt.f32.partialorder %v629_v60, 0.0  ;;  %v708_v20 = vadd.f32 %v707_v13, %v706_v39 }
 0x12b   :  { %v712_v21 = vrot.slane %v711_v6, 4  ;;  %v651_v23 = vsel %vm643_vm2, %v629_v60, 1.0  ;;  %v604_v50 = vadd.f32 %v603_v10, %v602_v15  ;;  %v907_v0 = vpop.eup %906  ;;  %v774_v48 = vrot.slane %v1411_v45, 1 }
 0x12c   :  { %v1399_v7 = vadd.f32 %v696_v14, %v695_v9  ;;  %912 = vrcp.f32 %v651_v23  ;;  %v1407_v24 = vsel %vm443_vm1, %v907_v0, 0.0  ;;  %v709_v16 = vrot.slane %v708_v20, 1 }
 0x12d   :  { %v713_v11 = vadd.f32 %v712_v21, %v711_v6  ;;  %v605_v8 = vrot.slane %v604_v50, 2  ;;  %v775_v23 = vrot.slane %v1411_v45, 2  ;;  %vm815_vm1 = vcmask 1044484  }
 0x12e   :  { %v710_v59 = vadd.f32 %v709_v16, %v708_v20  ;;  %v740_v14 = vrot.slane %v1399_v7, 4 }
 0x12f   :  { %v714_v27 = vrot.slane %v713_v11, 2  ;;  %v606_v41 = vadd.f32 %v605_v8, %v604_v50 }
 0x130   :  { %v909_v26 = vpop.eup %908  ;;  %v789_v56 = vadd.f32 %v1411_v45, %v710_v59  ;;  %v741_v50 = vadd.f32 %v740_v14, %v1399_v7 }
 0x131   :  { %v911_v32 = vpop.eup %910  ;;  %v673_v33 = vmul.f32 %v909_v26, %v1344_v17  ;;  %v674_v38 = vmul.f32 %v909_v26, %v1349_v31  ;;  %v715_v34 = vadd.f32 %v714_v27, %v713_v11  ;;  %v607_v36 = vrot.slane %v606_v41, 1 }
 0x132   :  { %v1416_v44 = vsel %vm444_vm13, %v911_v32, 0.0  ;;  %v742_v32 = vrot.slane %v741_v50, 2 }
 0x133   :  { %v689_v5 = vmul.f32 %v673_v33, %v1159_v42  ;;  %v690_v19 = vmul.f32 %v674_v38, %v1188_v1  ;;  %v630_v17 = vadd.f32 %v1416_v44, %v1407_v24  ;;  %v716_v46 = vrot.slane %v715_v34, 1 }
 0x134   :  { %v608_v35 = vadd.f32 %v607_v36, %v606_v41 }
 0x135   :  { %v718_v31 = vadd.f32 %v690_v19, %v689_v5  ;;  %v631_v40 = vrot.slane %v630_v17, 4  ;;  %v717_v51 = vadd.f32 %v716_v46, %v715_v34  ;;  %v743_v34 = vadd.f32 %v742_v32, %v741_v50 }
 0x136   :  { %v913_v57 = vpop.eup %912  ;;  %vm640_vm3 = vcmp.gt.f32.partialorder %v608_v35, 0.0 }
 0x137   :  { %v719_v47 = vrot.slane %v718_v31, 4  ;;  %v632_v28 = vadd.f32 %v631_v40, %v630_v17  ;;  %v682_v42 = vmul.f32 %v913_v57, %v1363_v4  ;;  %v648_v52 = vsel %vm640_vm3, %v608_v35, 1.0 }
 0x138   :  { %v681_v1 = vmul.f32 %v913_v57, %v1358_v53  ;;  %914 = vrcp.f32 %v648_v52  ;;  %v790_v12 = vadd.f32 %v774_v48, %v717_v51  ;;  %v733_v4 = vrot.slane %v1377_v62, 4 }
 0x139   :  { %v633_v63 = vrot.slane %v632_v28, 2  ;;  %v720_v37 = vadd.f32 %v719_v47, %v718_v31  ;;  %v698_v54 = vmul.f32 %v682_v42, %v1190_v2  ;;  %v744_v46 = vrot.slane %v743_v34, 1 }
 0x13a   :  { %v697_v39 = vmul.f32 %v681_v1, %v1161_v43  ;;  %v805_v60 = vrot.slane %v790_v12, 7  ;;  %v734_v43 = vadd.f32 %v733_v4, %v1377_v62  ;;  %v777_v42 = vrot.slane %v1411_v45, 4 }
 0x13b   :  { %v634_v22 = vadd.f32 %v633_v63, %v632_v28  ;;  %v721_v55 = vrot.slane %v720_v37, 2  ;;  %v745_v47 = vadd.f32 %v744_v46, %v743_v34  ;;  %v779_v63 = vrot.slane %v1411_v45, 6 }
 0x13c   :  { %v746_v15 = vadd.f32 %v698_v54, %v697_v39  ;;  %v807_v53 = vsel %vm806_vm12, %v805_v60, %v789_v56  ;;  %v735_v26 = vrot.slane %v734_v43, 2 }
 0x13d   :  { %v635_v6 = vrot.slane %v634_v22, 1  ;;  %v722_v9 = vadd.f32 %v721_v55, %v720_v37 }
 0x13e   :  { %v747_v21 = vrot.slane %v746_v15, 4  ;;  %v736_v16 = vadd.f32 %v735_v26, %v734_v43 }
 0x13f   :  { %v636_v13 = vadd.f32 %v635_v6, %v634_v22  ;;  %v723_v10 = vrot.slane %v722_v9, 1 }
 0x140   :  { %v748_v20 = vadd.f32 %v747_v21, %v746_v15 }
 0x141   :  { %vm644_vm13 = vcmp.gt.f32.partialorder %v636_v13, 0.0  ;;  %v724_v2 = vadd.f32 %v723_v10, %v722_v9  ;;  %v780_v10 = vrot.slane %v1411_v45, 7 }
 0x142   :  { %v652_v0 = vsel %vm644_vm13, %v636_v13, 1.0  ;;  %v915_v11 = vpop.eup %914  ;;  %v749_v38 = vrot.slane %v748_v20, 2 }
 0x143   :  { %916 = vrcp.f32 %v652_v0  ;;  %v791_v18 = vadd.f32 %v775_v23, %v724_v2  ;;  %v675_v25 = vmul.f32 %v915_v11, %v1382_v58  ;;  %v676_v8 = vmul.f32 %v915_v11, %v1389_v49 }
 0x144   :  { %v750_v19 = vadd.f32 %v749_v38, %v748_v20  ;;  %v737_v58 = vrot.slane %v736_v16, 1 }
 0x145   :  { %v808_v27 = vrot.slane %v791_v18, 6  ;;  %v691_v62 = vmul.f32 %v675_v25, %v1205_v29  ;;  %v692_v33 = vmul.f32 %v676_v8, %v1220_v61 }
 0x146   :  { %v751_v40 = vrot.slane %v750_v19, 1  ;;  %v738_v48 = vadd.f32 %v737_v58, %v736_v16 }
 0x147   :  { %v810_v41 = vsel %vm809_vm9, %v808_v27, %v807_v53  ;;  %v725_v7 = vadd.f32 %v692_v33, %v691_v62 }
 0x148   :  { %v752_v59 = vadd.f32 %v751_v40, %v750_v19  ;;  %v793_v37 = vadd.f32 %v777_v42, %v738_v48 }
 0x149   :  { %v726_v5 = vrot.slane %v725_v7, 4 }
 0x14a   :  { %v795_v39 = vadd.f32 %v779_v63, %v752_v59  ;;  %v814_v55 = vrot.slane %v793_v37, 4 }
 0x14b   :  { %v727_v36 = vadd.f32 %v726_v5, %v725_v7 }
 0x14c   :  { %v820_v6 = vrot.slane %v795_v39, 2 }
 0x14d   :  { %v917_v17 = vpop.eup %916  ;;  %v728_v35 = vrot.slane %v727_v36, 2 }
 0x14e   :  { %v683_v49 = vmul.f32 %v917_v17, %v1407_v24  ;;  %v684_v31 = vmul.f32 %v917_v17, %v1416_v44  ;;  %v776_v24 = vrot.slane %v1411_v45, 3  ;;  %v778_v44 = vrot.slane %v1411_v45, 5 }
 0x14f   :  { %v729_v51 = vadd.f32 %v728_v35, %v727_v36 }
 0x150   :  { %v699_v29 = vmul.f32 %v683_v49, %v1207_v30  ;;  %v700_v61 = vmul.f32 %v684_v31, %v1222_v3  ;;  %v794_v3 = vadd.f32 %v778_v44, %v745_v47 }
 0x151   :  { %v730_v57 = vrot.slane %v729_v51, 1 }
 0x152   :  { %v753_v28 = vadd.f32 %v700_v61, %v699_v29  ;;  %v817_v15 = vrot.slane %v794_v3, 3 }
 0x153   :  { %v731_v52 = vadd.f32 %v730_v57, %v729_v51 }
 0x154   :  { %v754_v1 = vrot.slane %v753_v28, 4 }
 0x155   :  { %v792_v12 = vadd.f32 %v776_v24, %v731_v52 }
 0x156   :  { %v755_v30 = vadd.f32 %v754_v1, %v753_v28 }
 0x157   :  { %v811_v22 = vrot.slane %v792_v12, 5 }
 0x158   :  { %v756_v54 = vrot.slane %v755_v30, 2 }
 0x159   :  { %v813_v60 = vsel %vm812_vm0, %v811_v22, %v810_v41 }
 0x15a   :  { %v757_v56 = vadd.f32 %v756_v54, %v755_v30  ;;  %v816_v4 = vsel %vm815_vm1, %v814_v55, %v813_v60 }
 0x15b   :  { %v819_v53 = vsel %vm818_vm8, %v817_v15, %v816_v4 }
 0x15c   :  { %v758_v9 = vrot.slane %v757_v56, 1  ;;  %v822_v14 = vsel %vm821_vm4, %v820_v6, %v819_v53 }
 0x15e   :  { %v759_v13 = vadd.f32 %v758_v9, %v757_v56 }
 0x160   :  { %v796_v21 = vadd.f32 %v780_v10, %v759_v13 }
 0x162   :  { %v823_v43 = vrot.slane %v796_v21, 1 }
 0x164   :  { %v825_v2 = vsel %vm824_vm5, %v823_v43, %v822_v14 }
 0x165   :  { %827 = vst [vmem:[#allocation2] sm:$0xff] %v825_v2 }
 0x166   :  { %929 = shalt.err (!%p926_p4)
}
 0x167   :  { %s930_s8 = scalar_lea.hbm %s1463_s5, 128 }
 0x168   :  { %p931_p5 = scmp.ne.s32.totalorder %s1463_s5, %s930_s8  ;;  %p934_p6 = scmp.lt.u32.totalorder %s930_s8, %s1463_s5 }
 0x16a   :  { %p936_p7 = pnand %p934_p6, %p931_p5 }
 0x16c   :  { %939 = shalt.err (!%p936_p7)
}
 0x16d   :  { %837 = dma.vmem_to_hbm [thread:$0]  %s835_s30, 128, %s1463_s5, [#allocation3]  }
 0x16e   :  { %940 = dma.done.wait [#allocation3], 128  }
 0x16f   :  { %941 = vsyncadd [#allocation3], 4294967168 }
 0x170   :  { %841 = vsyncpa [#allocation3], 1 }

</bundles_post_ra>
